<compile_context>
chip_gen: v5e
topology: v5e:2x2
jax: 0.10.0
libtpu: 0.0.40
codegen_flags: <defaults>
</compile_context>

<pallas_src>
import jax
import jax.numpy as jnp
from jax.experimental import pallas as pl
from jax.experimental.pallas import tpu as pltpu

# Small, forward-consistent shapes
B, F, T = 2, 4, 8      # batch, num_features, t_length
E = 4                  # time_encoding_size
D_IN = 16              # ts_encoding['input_size'] (projection output size)
H = 32                 # hidden_size
C = 3                  # num_classes

TB = 8                 # batch tile = f32 sublane quantum (use >=128 for real batches)


def ts_classifier_kernel(
    x_ref,        # (TB, T, F)   input time series tile (already swapaxes'd)
    ts_ref,       # (TB, T)      raw timestamps tile
    wpx_ref,      # (F, D_IN)    projection weight, feature part
    weff_ref,     # (1, D_IN)    folded time-encoding weight  (w_time @ w_proj_t)
    beff_ref,     # (1, D_IN)    folded bias                   (b_time @ w_proj_t + b_proj)
    wih_ref,      # (D_IN, H)    RNN input->hidden weight
    whh_ref,      # (H, H)       RNN hidden->hidden weight
    brnn_ref,     # (1, H)       merged RNN bias (b_ih + b_hh)
    wdec_ref,     # (H, C)       decoder weight
    bdec_ref,     # (1, C)       decoder bias
    out_ref,      # (TB, C)      class probabilities tile
):
    x = x_ref[...]                      # (TB, T, F)
    ts = ts_ref[...]                    # (TB, T)

    # min_max_norm over the time axis, per sample
    # TODO(synk): confirm the reference min_max_norm epsilon for constant (max==min) rows.
    t_min = jnp.min(ts, axis=-1, keepdims=True)
    t_max = jnp.max(ts, axis=-1, keepdims=True)
    ts_n = (ts - t_min) / (t_max - t_min + 1e-8)

    # projection Linear(F + E, D_IN) on concat([X, Linear(1,E)(ts_n)], -1), written
    # concat-free with the time-encoding Linear folded into constant w_eff / b_eff:
    #   cat([X, enc]) @ W_proj == X @ Wp_x + ts_n[..., None] * w_eff + b_eff
    xp = (
        jnp.einsum("btf,fd->btd", x, wpx_ref[...],
                   preferred_element_type=jnp.float32)
        + ts_n[:, :, None] * weff_ref[...]
        + beff_ref[...]
    )                                   # (TB, T, D_IN)

    # Hoisted input-to-hidden matmul for all timesteps + merged biases (no sequential dep).
    gates = (
        jnp.einsum("btd,dh->bth", xp, wih_ref[...],
                   preferred_element_type=jnp.float32)
        + brnn_ref[...]
    )                                   # (TB, T, H)

    # tanh-RNN recurrence; T is static -> fully unrolled, only h @ w_hh on the serial path.
    w_hh = whh_ref[...]
    h = jnp.zeros((TB, H), dtype=jnp.float32)
    for t in range(T):
        h = jnp.tanh(
            gates[:, t, :]
            + jnp.dot(h, w_hh, preferred_element_type=jnp.float32)
        )

    # decoder: Linear(H, C) followed by softmax -> class probabilities
    logits = jnp.dot(h, wdec_ref[...],
                     preferred_element_type=jnp.float32) + bdec_ref[...]
    m = jnp.max(logits, axis=-1, keepdims=True)
    e = jnp.exp(logits - m)
    denom = jnp.sum(e, axis=-1, keepdims=True)
    out_ref[...] = (e * pl.reciprocal(denom)).astype(out_ref.dtype)


def init_params(key):
    ks = jax.random.split(key, 9)
    scale = 0.1
    return {
        "w_time":   scale * jax.random.normal(ks[0], (1, E), jnp.float32),
        "b_time":   scale * jax.random.normal(ks[1], (1, E), jnp.float32),
        "w_proj_x": scale * jax.random.normal(ks[2], (F, D_IN), jnp.float32),
        "w_proj_t": scale * jax.random.normal(ks[3], (E, D_IN), jnp.float32),
        "b_proj":   jnp.zeros((1, D_IN), jnp.float32),
        "w_ih":     scale * jax.random.normal(ks[4], (D_IN, H), jnp.float32),
        "w_hh":     scale * jax.random.normal(ks[5], (H, H), jnp.float32),
        "b_ih":     jnp.zeros((1, H), jnp.float32),
        "b_hh":     jnp.zeros((1, H), jnp.float32),
        "w_dec":    scale * jax.random.normal(ks[6], (H, C), jnp.float32),
        "b_dec":    scale * jax.random.normal(ks[7], (1, C), jnp.float32),
    }


def _full_spec(shape):
    nd = len(shape)
    return pl.BlockSpec(shape, lambda i, _nd=nd: (0,) * _nd)


@jax.jit
def ts_classifier(X, timestamps, params):
    # X: (B, F, T) as in PyTorch; swapaxes(1, 2) glue identical to TSEncoder.forward.
    x_btf = jnp.swapaxes(X, 1, 2).astype(jnp.float32)          # (B, T, F)
    ts = timestamps.astype(jnp.float32)                        # (B, T)

    bx = x_btf.shape[0]
    n_tiles = pl.cdiv(bx, TB)
    bp = n_tiles * TB
    x_p = jnp.pad(x_btf, ((0, bp - bx), (0, 0), (0, 0)))
    ts_p = jnp.pad(ts, ((0, bp - bx), (0, 0)))

    # Constant folds of parameters (weight-weight products; done once under jit).
    w_eff = params["w_time"] @ params["w_proj_t"]                       # (1, D_IN)
    b_eff = params["b_time"] @ params["w_proj_t"] + params["b_proj"]    # (1, D_IN)
    b_rnn = params["b_ih"] + params["b_hh"]                             # (1, H)

    out = pl.pallas_call(
        ts_classifier_kernel,
        out_shape=jax.ShapeDtypeStruct((bp, C), jnp.float32),
        grid=(n_tiles,),
        in_specs=[
            pl.BlockSpec((TB, T, F), lambda i: (i, 0, 0)),
            pl.BlockSpec((TB, T), lambda i: (i, 0)),
            _full_spec((F, D_IN)),
            _full_spec((1, D_IN)),
            _full_spec((1, D_IN)),
            _full_spec((D_IN, H)),
            _full_spec((H, H)),
            _full_spec((1, H)),
            _full_spec((H, C)),
            _full_spec((1, C)),
        ],
        out_specs=pl.BlockSpec((TB, C), lambda i: (i, 0)),
        compiler_params=pltpu.CompilerParams(
            dimension_semantics=("parallel",)),
    )(x_p, ts_p, params["w_proj_x"], w_eff, b_eff,
      params["w_ih"], params["w_hh"], b_rnn,
      params["w_dec"], params["b_dec"])
    return out[:bx]


def reference_forward(X, timestamps, p):
    """Pure-JAX reference matching the PyTorch module semantics."""
    x = jnp.swapaxes(X, 1, 2).astype(jnp.float32)              # (B, T, F)
    ts = timestamps.astype(jnp.float32)
    t_min = jnp.min(ts, axis=-1, keepdims=True)
    t_max = jnp.max(ts, axis=-1, keepdims=True)
    ts_n = (ts - t_min) / (t_max - t_min + 1e-8)
    enc = ts_n[:, :, None] * p["w_time"] + p["b_time"]         # (B, T, E)
    xp = x @ p["w_proj_x"] + enc @ p["w_proj_t"] + p["b_proj"]  # (B, T, D_IN)
    h = jnp.zeros((X.shape[0], H), jnp.float32)
    for t in range(T):
        h = jnp.tanh(xp[:, t, :] @ p["w_ih"] + p["b_ih"] + h @ p["w_hh"] + p["b_hh"])
    logits = h @ p["w_dec"] + p["b_dec"]
    return jax.nn.softmax(logits, axis=-1)


if __name__ == "__main__":
    key = jax.random.PRNGKey(0)
    k_x, k_t, k_p = jax.random.split(key, 3)

    X = jax.random.normal(k_x, (B, F, T), jnp.float32)             # (batch, features, t_length)
    timestamps = (jnp.arange(T, dtype=jnp.float32)[None, :]
                  + 0.1 * jax.random.normal(k_t, (B, T), jnp.float32))  # (batch, t_length)
    params = init_params(k_p)

    probs = ts_classifier(X, timestamps, params)
    jax.block_until_ready(probs)

    ref = reference_forward(X, timestamps, params)

    assert probs.shape == (B, C)
    assert bool(jnp.all(jnp.isfinite(probs)))
    # softmax rows sum to 1
    assert bool(jnp.allclose(jnp.sum(probs, axis=-1), 1.0, atol=1e-5))
    # matches pure-JAX reference of the module forward
    assert bool(jnp.allclose(probs, ref, atol=1e-5, rtol=1e-4))
    print("KERNEL_OK")
</pallas_src>

<mosaic_0001>
module attributes {stable_mosaic.version = 11 : i64} {
  func.func @ts_classifier_kernel(%arg0: i32, %arg1: memref<8x8x4xf32, #tpu.memory_space<vmem>>, %arg2: memref<8x8xf32, #tpu.memory_space<vmem>>, %arg3: memref<4x16xf32, #tpu.memory_space<vmem>>, %arg4: memref<1x16xf32, #tpu.memory_space<vmem>>, %arg5: memref<1x16xf32, #tpu.memory_space<vmem>>, %arg6: memref<16x32xf32, #tpu.memory_space<vmem>>, %arg7: memref<32x32xf32, #tpu.memory_space<vmem>>, %arg8: memref<1x32xf32, #tpu.memory_space<vmem>>, %arg9: memref<32x3xf32, #tpu.memory_space<vmem>>, %arg10: memref<1x3xf32, #tpu.memory_space<vmem>>, %arg11: memref<8x3xf32, #tpu.memory_space<vmem>>) attributes {dimension_semantics = [#tpu.dimension_semantics<parallel>], iteration_bounds = array<i64: 1>, scalar_prefetch = 0 : i64, scratch_operands = 0 : i64, tpu.core_type = #tpu.core_type<tc>, window_params = [{transform_indices = @transform_0, window_bounds = array<i64: 8, 8, 4>}, {transform_indices = @transform_1, window_bounds = array<i64: 8, 8>}, {pipeline_mode = #tpu.pipeline_mode<synchronous>, transform_indices = @transform_2, window_bounds = array<i64: 4, 16>}, {pipeline_mode = #tpu.pipeline_mode<synchronous>, transform_indices = @transform_3, window_bounds = array<i64: 1, 16>}, {pipeline_mode = #tpu.pipeline_mode<synchronous>, transform_indices = @transform_4, window_bounds = array<i64: 1, 16>}, {pipeline_mode = #tpu.pipeline_mode<synchronous>, transform_indices = @transform_5, window_bounds = array<i64: 16, 32>}, {pipeline_mode = #tpu.pipeline_mode<synchronous>, transform_indices = @transform_6, window_bounds = array<i64: 32, 32>}, {pipeline_mode = #tpu.pipeline_mode<synchronous>, transform_indices = @transform_7, window_bounds = array<i64: 1, 32>}, {pipeline_mode = #tpu.pipeline_mode<synchronous>, transform_indices = @transform_8, window_bounds = array<i64: 32, 3>}, {pipeline_mode = #tpu.pipeline_mode<synchronous>, transform_indices = @transform_9, window_bounds = array<i64: 1, 3>}, {transform_indices = @transform_10, window_bounds = array<i64: 8, 3>}]} {
    %c0 = arith.constant 0 : index
    %c0_0 = arith.constant 0 : index
    %c0_1 = arith.constant 0 : index
    %0 = vector.load %arg1[%c0, %c0_0, %c0_1] : memref<8x8x4xf32, #tpu.memory_space<vmem>>, vector<8x8x4xf32>
    %c0_2 = arith.constant 0 : index
    %c0_3 = arith.constant 0 : index
    %1 = vector.load %arg2[%c0_2, %c0_3] : memref<8x8xf32, #tpu.memory_space<vmem>>, vector<8x8xf32>
    %cst = arith.constant dense<0x7F800000> : vector<8xf32>
    %2 = vector.multi_reduction <minimumf>, %1, %cst [1] : vector<8x8xf32> to vector<8xf32>
    %3 = vector.shape_cast %2 : vector<8xf32> to vector<8x1xf32>
    %cst_4 = arith.constant dense<0xFF800000> : vector<8xf32>
    %4 = vector.multi_reduction <maximumf>, %1, %cst_4 [1] : vector<8x8xf32> to vector<8xf32>
    %5 = vector.shape_cast %4 : vector<8xf32> to vector<8x1xf32>
    %6 = vector.broadcast %3 : vector<8x1xf32> to vector<8x8xf32>
    %7 = arith.subf %1, %6 : vector<8x8xf32>
    %8 = arith.subf %5, %3 : vector<8x1xf32>
    %cst_5 = arith.constant 9.99999993E-9 : f32
    %9 = vector.broadcast %cst_5 : f32 to vector<8x1xf32>
    %10 = arith.addf %8, %9 : vector<8x1xf32>
    %11 = vector.broadcast %10 : vector<8x1xf32> to vector<8x8xf32>
    %12 = arith.divf %7, %11 : vector<8x8xf32>
    %c0_6 = arith.constant 0 : index
    %c0_7 = arith.constant 0 : index
    %13 = vector.load %arg3[%c0_6, %c0_7] : memref<4x16xf32, #tpu.memory_space<vmem>>, vector<4x16xf32>
    "tpu.trace_start"() <{level = 10 : i32, message = "btf,fd->btd"}> : () -> ()
    %cst_8 = arith.constant dense<0.000000e+00> : vector<8x8x16xf32>
    %14 = tpu.matmul %0, %13, %cst_8 {dimension_numbers = #tpu.dot_dimension_numbers<[2], [0], [0, 1], [1], [0, 0, 0, 1, 1, 1], [], []>} : vector<8x8x4xf32>, vector<4x16xf32>, vector<8x8x16xf32> -> vector<8x8x16xf32>
    "tpu.trace_stop"() : () -> ()
    %15 = vector.shape_cast %12 : vector<8x8xf32> to vector<8x8x1xf32>
    %c0_9 = arith.constant 0 : index
    %c0_10 = arith.constant 0 : index
    %16 = vector.load %arg4[%c0_9, %c0_10] : memref<1x16xf32, #tpu.memory_space<vmem>>, vector<1x16xf32>
    %17 = vector.shape_cast %16 : vector<1x16xf32> to vector<1x1x16xf32>
    %18 = vector.broadcast %15 : vector<8x8x1xf32> to vector<8x8x16xf32>
    %19 = vector.broadcast %17 : vector<1x1x16xf32> to vector<8x8x16xf32>
    %20 = arith.mulf %18, %19 : vector<8x8x16xf32>
    %21 = arith.addf %14, %20 : vector<8x8x16xf32>
    %c0_11 = arith.constant 0 : index
    %c0_12 = arith.constant 0 : index
    %22 = vector.load %arg5[%c0_11, %c0_12] : memref<1x16xf32, #tpu.memory_space<vmem>>, vector<1x16xf32>
    %23 = vector.shape_cast %22 : vector<1x16xf32> to vector<1x1x16xf32>
    %24 = vector.broadcast %23 : vector<1x1x16xf32> to vector<8x8x16xf32>
    %25 = arith.addf %21, %24 : vector<8x8x16xf32>
    %c0_13 = arith.constant 0 : index
    %c0_14 = arith.constant 0 : index
    %26 = vector.load %arg6[%c0_13, %c0_14] : memref<16x32xf32, #tpu.memory_space<vmem>>, vector<16x32xf32>
    "tpu.trace_start"() <{level = 10 : i32, message = "btd,dh->bth"}> : () -> ()
    %cst_15 = arith.constant dense<0.000000e+00> : vector<8x8x32xf32>
    %27 = tpu.matmul %25, %26, %cst_15 {dimension_numbers = #tpu.dot_dimension_numbers<[2], [0], [0, 1], [1], [0, 0, 0, 1, 1, 1], [], []>} : vector<8x8x16xf32>, vector<16x32xf32>, vector<8x8x32xf32> -> vector<8x8x32xf32>
    "tpu.trace_stop"() : () -> ()
    %c0_16 = arith.constant 0 : index
    %c0_17 = arith.constant 0 : index
    %28 = vector.load %arg8[%c0_16, %c0_17] : memref<1x32xf32, #tpu.memory_space<vmem>>, vector<1x32xf32>
    %29 = vector.shape_cast %28 : vector<1x32xf32> to vector<1x1x32xf32>
    %30 = vector.broadcast %29 : vector<1x1x32xf32> to vector<8x8x32xf32>
    %31 = arith.addf %27, %30 : vector<8x8x32xf32>
    %c0_18 = arith.constant 0 : index
    %c0_19 = arith.constant 0 : index
    %32 = vector.load %arg7[%c0_18, %c0_19] : memref<32x32xf32, #tpu.memory_space<vmem>>, vector<32x32xf32>
    %cst_20 = arith.constant 0.000000e+00 : f32
    %33 = vector.broadcast %cst_20 : f32 to vector<8x32xf32>
    %34 = vector.extract_strided_slice %31 {offsets = [0, 0, 0], sizes = [8, 1, 32], strides = [1, 1, 1]} : vector<8x8x32xf32> to vector<8x1x32xf32>
    %35 = vector.shape_cast %34 : vector<8x1x32xf32> to vector<8x32xf32>
    %cst_21 = arith.constant dense<0.000000e+00> : vector<8x32xf32>
    %36 = tpu.matmul %33, %32, %cst_21 {dimension_numbers = #tpu.dot_dimension_numbers<[1], [0], [0], [1], [0, 0, 1, 1], [], []>} : vector<8x32xf32>, vector<32x32xf32>, vector<8x32xf32> -> vector<8x32xf32>
    %37 = arith.addf %35, %36 : vector<8x32xf32>
    %38 = math.tanh %37 : vector<8x32xf32>
    %39 = vector.extract_strided_slice %31 {offsets = [0, 1, 0], sizes = [8, 1, 32], strides = [1, 1, 1]} : vector<8x8x32xf32> to vector<8x1x32xf32>
    %40 = vector.shape_cast %39 : vector<8x1x32xf32> to vector<8x32xf32>
    %cst_22 = arith.constant dense<0.000000e+00> : vector<8x32xf32>
    %41 = tpu.matmul %38, %32, %cst_22 {dimension_numbers = #tpu.dot_dimension_numbers<[1], [0], [0], [1], [0, 0, 1, 1], [], []>} : vector<8x32xf32>, vector<32x32xf32>, vector<8x32xf32> -> vector<8x32xf32>
    %42 = arith.addf %40, %41 : vector<8x32xf32>
    %43 = math.tanh %42 : vector<8x32xf32>
    %44 = vector.extract_strided_slice %31 {offsets = [0, 2, 0], sizes = [8, 1, 32], strides = [1, 1, 1]} : vector<8x8x32xf32> to vector<8x1x32xf32>
    %45 = vector.shape_cast %44 : vector<8x1x32xf32> to vector<8x32xf32>
    %cst_23 = arith.constant dense<0.000000e+00> : vector<8x32xf32>
    %46 = tpu.matmul %43, %32, %cst_23 {dimension_numbers = #tpu.dot_dimension_numbers<[1], [0], [0], [1], [0, 0, 1, 1], [], []>} : vector<8x32xf32>, vector<32x32xf32>, vector<8x32xf32> -> vector<8x32xf32>
    %47 = arith.addf %45, %46 : vector<8x32xf32>
    %48 = math.tanh %47 : vector<8x32xf32>
    %49 = vector.extract_strided_slice %31 {offsets = [0, 3, 0], sizes = [8, 1, 32], strides = [1, 1, 1]} : vector<8x8x32xf32> to vector<8x1x32xf32>
    %50 = vector.shape_cast %49 : vector<8x1x32xf32> to vector<8x32xf32>
    %cst_24 = arith.constant dense<0.000000e+00> : vector<8x32xf32>
    %51 = tpu.matmul %48, %32, %cst_24 {dimension_numbers = #tpu.dot_dimension_numbers<[1], [0], [0], [1], [0, 0, 1, 1], [], []>} : vector<8x32xf32>, vector<32x32xf32>, vector<8x32xf32> -> vector<8x32xf32>
    %52 = arith.addf %50, %51 : vector<8x32xf32>
    %53 = math.tanh %52 : vector<8x32xf32>
    %54 = vector.extract_strided_slice %31 {offsets = [0, 4, 0], sizes = [8, 1, 32], strides = [1, 1, 1]} : vector<8x8x32xf32> to vector<8x1x32xf32>
    %55 = vector.shape_cast %54 : vector<8x1x32xf32> to vector<8x32xf32>
    %cst_25 = arith.constant dense<0.000000e+00> : vector<8x32xf32>
    %56 = tpu.matmul %53, %32, %cst_25 {dimension_numbers = #tpu.dot_dimension_numbers<[1], [0], [0], [1], [0, 0, 1, 1], [], []>} : vector<8x32xf32>, vector<32x32xf32>, vector<8x32xf32> -> vector<8x32xf32>
    %57 = arith.addf %55, %56 : vector<8x32xf32>
    %58 = math.tanh %57 : vector<8x32xf32>
    %59 = vector.extract_strided_slice %31 {offsets = [0, 5, 0], sizes = [8, 1, 32], strides = [1, 1, 1]} : vector<8x8x32xf32> to vector<8x1x32xf32>
    %60 = vector.shape_cast %59 : vector<8x1x32xf32> to vector<8x32xf32>
    %cst_26 = arith.constant dense<0.000000e+00> : vector<8x32xf32>
    %61 = tpu.matmul %58, %32, %cst_26 {dimension_numbers = #tpu.dot_dimension_numbers<[1], [0], [0], [1], [0, 0, 1, 1], [], []>} : vector<8x32xf32>, vector<32x32xf32>, vector<8x32xf32> -> vector<8x32xf32>
    %62 = arith.addf %60, %61 : vector<8x32xf32>
    %63 = math.tanh %62 : vector<8x32xf32>
    %64 = vector.extract_strided_slice %31 {offsets = [0, 6, 0], sizes = [8, 1, 32], strides = [1, 1, 1]} : vector<8x8x32xf32> to vector<8x1x32xf32>
    %65 = vector.shape_cast %64 : vector<8x1x32xf32> to vector<8x32xf32>
    %cst_27 = arith.constant dense<0.000000e+00> : vector<8x32xf32>
    %66 = tpu.matmul %63, %32, %cst_27 {dimension_numbers = #tpu.dot_dimension_numbers<[1], [0], [0], [1], [0, 0, 1, 1], [], []>} : vector<8x32xf32>, vector<32x32xf32>, vector<8x32xf32> -> vector<8x32xf32>
    %67 = arith.addf %65, %66 : vector<8x32xf32>
    %68 = math.tanh %67 : vector<8x32xf32>
    %69 = vector.extract_strided_slice %31 {offsets = [0, 7, 0], sizes = [8, 1, 32], strides = [1, 1, 1]} : vector<8x8x32xf32> to vector<8x1x32xf32>
    %70 = vector.shape_cast %69 : vector<8x1x32xf32> to vector<8x32xf32>
    %cst_28 = arith.constant dense<0.000000e+00> : vector<8x32xf32>
    %71 = tpu.matmul %68, %32, %cst_28 {dimension_numbers = #tpu.dot_dimension_numbers<[1], [0], [0], [1], [0, 0, 1, 1], [], []>} : vector<8x32xf32>, vector<32x32xf32>, vector<8x32xf32> -> vector<8x32xf32>
    %72 = arith.addf %70, %71 : vector<8x32xf32>
    %73 = math.tanh %72 : vector<8x32xf32>
    %c0_29 = arith.constant 0 : index
    %c0_30 = arith.constant 0 : index
    %74 = vector.load %arg9[%c0_29, %c0_30] : memref<32x3xf32, #tpu.memory_space<vmem>>, vector<32x3xf32>
    %cst_31 = arith.constant dense<0.000000e+00> : vector<8x3xf32>
    %75 = tpu.matmul %73, %74, %cst_31 {dimension_numbers = #tpu.dot_dimension_numbers<[1], [0], [0], [1], [0, 0, 1, 1], [], []>} : vector<8x32xf32>, vector<32x3xf32>, vector<8x3xf32> -> vector<8x3xf32>
    %c0_32 = arith.constant 0 : index
    %c0_33 = arith.constant 0 : index
    %76 = vector.load %arg10[%c0_32, %c0_33] : memref<1x3xf32, #tpu.memory_space<vmem>>, vector<1x3xf32>
    %77 = vector.broadcast %76 : vector<1x3xf32> to vector<8x3xf32>
    %78 = arith.addf %75, %77 : vector<8x3xf32>
    %cst_34 = arith.constant dense<0xFF800000> : vector<8xf32>
    %79 = vector.multi_reduction <maximumf>, %78, %cst_34 [1] : vector<8x3xf32> to vector<8xf32>
    %80 = vector.shape_cast %79 : vector<8xf32> to vector<8x1xf32>
    %81 = vector.broadcast %80 : vector<8x1xf32> to vector<8x3xf32>
    %82 = arith.subf %78, %81 : vector<8x3xf32>
    %83 = math.exp %82 : vector<8x3xf32>
    %cst_35 = arith.constant dense<0.000000e+00> : vector<8xf32>
    %84 = vector.multi_reduction <add>, %83, %cst_35 [1] : vector<8x3xf32> to vector<8xf32>
    %85 = vector.shape_cast %84 : vector<8xf32> to vector<8x1xf32>
    %86 = tpu.reciprocal %85 : vector<8x1xf32> -> vector<8x1xf32>
    %87 = vector.broadcast %86 : vector<8x1xf32> to vector<8x3xf32>
    %88 = arith.mulf %83, %87 : vector<8x3xf32>
    %c0_36 = arith.constant 0 : index
    %c0_37 = arith.constant 0 : index
    %89 = vector.load %arg11[%c0_36, %c0_37] : memref<8x3xf32, #tpu.memory_space<vmem>>, vector<8x3xf32>
    tpu.vector_store %arg11[%c0_36, %c0_37], %88 {strides = array<i32>} : memref<8x3xf32, #tpu.memory_space<vmem>>, vector<8x3xf32>,
    return
  }
  func.func @transform_0(%arg0: i32) -> (i32, i32, i32) {
    %c0_i32 = arith.constant 0 : i32
    %c0_i32_0 = arith.constant 0 : i32
    %c0_i32_1 = arith.constant 0 : i32
    return %arg0, %c0_i32, %c0_i32_0 : i32, i32, i32
  }
  func.func @transform_1(%arg0: i32) -> (i32, i32) {
    %c0_i32 = arith.constant 0 : i32
    %c0_i32_0 = arith.constant 0 : i32
    return %arg0, %c0_i32 : i32, i32
  }
  func.func @transform_2(%arg0: i32) -> (i32, i32) {
    %c0_i32 = arith.constant 0 : i32
    %c0_i32_0 = arith.constant 0 : i32
    %c0_i32_1 = arith.constant 0 : i32
    return %c0_i32, %c0_i32_0 : i32, i32
  }
  func.func @transform_3(%arg0: i32) -> (i32, i32) {
    %c0_i32 = arith.constant 0 : i32
    %c0_i32_0 = arith.constant 0 : i32
    %c0_i32_1 = arith.constant 0 : i32
    return %c0_i32, %c0_i32_0 : i32, i32
  }
  func.func @transform_4(%arg0: i32) -> (i32, i32) {
    %c0_i32 = arith.constant 0 : i32
    %c0_i32_0 = arith.constant 0 : i32
    %c0_i32_1 = arith.constant 0 : i32
    return %c0_i32, %c0_i32_0 : i32, i32
  }
  func.func @transform_5(%arg0: i32) -> (i32, i32) {
    %c0_i32 = arith.constant 0 : i32
    %c0_i32_0 = arith.constant 0 : i32
    %c0_i32_1 = arith.constant 0 : i32
    return %c0_i32, %c0_i32_0 : i32, i32
  }
  func.func @transform_6(%arg0: i32) -> (i32, i32) {
    %c0_i32 = arith.constant 0 : i32
    %c0_i32_0 = arith.constant 0 : i32
    %c0_i32_1 = arith.constant 0 : i32
    return %c0_i32, %c0_i32_0 : i32, i32
  }
  func.func @transform_7(%arg0: i32) -> (i32, i32) {
    %c0_i32 = arith.constant 0 : i32
    %c0_i32_0 = arith.constant 0 : i32
    %c0_i32_1 = arith.constant 0 : i32
    return %c0_i32, %c0_i32_0 : i32, i32
  }
  func.func @transform_8(%arg0: i32) -> (i32, i32) {
    %c0_i32 = arith.constant 0 : i32
    %c0_i32_0 = arith.constant 0 : i32
    %c0_i32_1 = arith.constant 0 : i32
    return %c0_i32, %c0_i32_0 : i32, i32
  }
  func.func @transform_9(%arg0: i32) -> (i32, i32) {
    %c0_i32 = arith.constant 0 : i32
    %c0_i32_0 = arith.constant 0 : i32
    %c0_i32_1 = arith.constant 0 : i32
    return %c0_i32, %c0_i32_0 : i32, i32
  }
  func.func @transform_10(%arg0: i32) -> (i32, i32) {
    %c0_i32 = arith.constant 0 : i32
    %c0_i32_0 = arith.constant 0 : i32
    return %arg0, %c0_i32 : i32, i32
  }
}

</mosaic_0001>

<bundles_post_ra>
// kernel: ts_classifier.1
= control target key start
LH: loop header
LB: loop body
LE: loop exit
PB: predicated region body
PF: predicated region fallthrough
CT: control target
= control target key end

     0   :  { %vm44_vm0 = vcmask 64512   ;;  %vm163_vm1 = vcmask 1043456   ;;  %vm138_vm2 = vcmask 31744   ;;  %v71_v9 = vlaneseq  ;;  %s1477_s1 = inlined_call_operand.vmem [shape: f32[8,8], index: 1, kind: input, shape index: {}]   ;;  %s1478_s2 = inlined_call_operand.vmem [shape: f32[4,16], index: 2, kind: input, shape index: {}]   ;;  %s1479_s0 = inlined_call_operand.vmem [shape: f32[8,8,4], index: 0, kind: input, shape index: {}]   ;;  %s1480_s3 = inlined_call_operand.vmem [shape: f32[1,16], index: 3, kind: input, shape index: {}]   ;;  %s1481_s4 = inlined_call_operand.vmem [shape: f32[1,16], index: 4, kind: input, shape index: {}]   ;;  %s1482_s7 = inlined_call_operand.vmem [shape: f32[1,32], index: 7, kind: input, shape index: {}]   ;;  %s1483_s6 = inlined_call_operand.vmem [shape: f32[32,32], index: 6, kind: input, shape index: {}]   ;;  %s1484_s5 = inlined_call_operand.vmem [shape: f32[16,32], index: 5, kind: input, shape index: {}]   ;;  %s1485_s9 = inlined_call_operand.vmem [shape: f32[1,3], index: 9, kind: input, shape index: {}]   ;;  %s1486_s8 = inlined_call_operand.vmem [shape: f32[32,3], index: 8, kind: input, shape index: {}]   ;;  %s1487_s10 = inlined_call_operand.vmem [shape: f32[8,3], index: 10, kind: output, shape index: {}]  }
   0x1   :  { %v43_v0 = vld [vmem:[%s1477_s1] sm:$0xff]  ;;  %v36_v5 = vld [vmem:[%s1479_s0 + $0x8] sm:$0xff]  ;;  %v37_v6 = vld [vmem:[%s1479_s0 + $0x10] sm:$0xff]  ;;  %v1143_v44 = vmov 0.0   ;;  %vm226_vm7 = vcmask 130048   ;;  %vm361_vm8 = vcmask 1041409  }
   0x2   :  { %v69_v1 = vld [vmem:[%s1478_s2] sm:$0xf]  ;;  %v45_v3 = vsel %vm44_vm0, %v43_v0, inf  ;;  %v48_v4 = vsel %vm44_vm0, %v43_v0, -inf  ;;  %v38_v7 = vld [vmem:[%s1479_s0 + $0x18] sm:$0xff]  ;;  %v72_v11 = vshrl.u32 %v71_v9, 7 }
   0x3   :  { %v35_v2 = vld [vmem:[%s1479_s0] sm:$0xff]  ;;  %973 = vmatpush.msk.msra.mxu0 %vm163_vm1, %v69_v1  ;;  %998 = vmatpush.msk.msra.mxu3 %vm163_vm1, %v69_v1  ;;  %v42_v8 = vld [vmem:[%s1479_s0 + $0x38] sm:$0xff]  ;;  %v40_v13 = vld [vmem:[%s1479_s0 + $0x28] sm:$0xff]  ;;  %vm364_vm9 = vcmask 1042434   ;;  %vm367_vm10 = vcmask 1043459   ;;  %vm370_vm11 = vcmask 1044484  }
   0x4   :  { %46 = vmin.xlane.f32.xlu0 %v45_v3  ;;  %974 = vmatmul.msk.f32.vlgmr.msra.gmra.mxu0 %vm138_vm2, %v35_v2  ;;  %v39_v10 = vld [vmem:[%s1479_s0 + $0x20] sm:$0xff]  ;;  %v41_v17 = vld [vmem:[%s1479_s0 + $0x30] sm:$0xff]  ;;  %v1240_v38 = vld [vmem:[%s1483_s6 + $0x18] sm:$0xff]  ;;  %vm373_vm12 = vcmask 1045509   ;;  %vm376_vm13 = vcmask 1046534   ;;  %vm379_vm14 = vcmask 1047559  }
   0x5   :  { %981 = vmatmul.msk.f32.vlgmr.msra.gmra.mxu3 %vm138_vm2, %v42_v8  ;;  %1004 = vset.pattern.permute.xlu0 %v72_v11  ;;  %v1246_v39 = vld [vmem:[%s1483_s6 + $0x10] sm:$0xff]  ;;  %v221_v40 = vld [vmem:[%s1484_s5 + $0x8] sm:$0xff]  ;;  %v220_v42 = vld [vmem:[%s1484_s5] sm:$0xff]  ;;  %vm296_vm15 = vcmask 261120   ;;  %vm943_vm0 = vcmask 23552  }
   0x6   :  { %1003 = vset.pattern.permute.xlu2 %v72_v11  ;;  %1002 = vset.pattern.permute.xlu1 %v72_v11  ;;  %v1255_v41 = vld [vmem:[%s1483_s6 + $0x8] sm:$0xff]  ;;  %v1264_v43 = vld [vmem:[%s1483_s6] sm:$0xff] }
   0x7   :  { %312 = vmatpush.msra.mxu2 %v1240_v38  ;;  %999 = vmatpush.msrb.mxu3 %v221_v40  ;;  %v1005_v48 = vld [vmem:[%s1480_s3] ss:$0 sm:$0xff] }
   0x8   :  { %265 = vmatpush.msra.mxu1 %v221_v40  ;;  %v1006_v52 = vld [vmem:[%s1481_s4] ss:$0 sm:$0xff] }
   0x9   :  { %313 = vmatpush.msra.mxu2 %v1246_v39  ;;  %1000 = vmatpush.msrb.mxu3 %v220_v42 }
   0xa   :  { %266 = vmatpush.msra.mxu1 %v220_v42 }
   0xb   :  { %314 = vmatpush.msra.mxu2 %v1255_v41  ;;  %395 = vmatpush.msra.mxu3 %v1240_v38 }
   0xc   :  { %49 = vmax.xlane.f32.xlu0 %v48_v4  ;;  %975 = vmatmul.msk.f32.gmra.mxu0 %vm138_vm2, %v36_v5 }
   0xd   :  { %315 = vmatpush.msra.mxu2 %v1264_v43  ;;  %396 = vmatpush.msra.mxu3 %v1246_v39 }
   0xe   :  { %316 = vmatmul.f32.vlgmr.msra.gmra.mxu2 %v1143_v44 }
   0xf   :  { %471 = vmatpush.msrb.mxu2 %v1240_v38  ;;  %397 = vmatpush.msra.mxu3 %v1255_v41 }
  0x11   :  { %472 = vmatpush.msrb.mxu2 %v1246_v39  ;;  %398 = vmatpush.msra.mxu3 %v1264_v43 }
  0x13   :  { %473 = vmatpush.msrb.mxu2 %v1255_v41 }
  0x14   :  { %976 = vmatmul.msk.f32.gmra.mxu0 %vm138_vm2, %v37_v6 }
  0x15   :  { %474 = vmatpush.msrb.mxu2 %v1264_v43 }
  0x17   :  { %623 = vmatpush.msra.mxu2 %v1240_v38 }
  0x19   :  { %624 = vmatpush.msra.mxu2 %v1246_v39 }
  0x1b   :  { %625 = vmatpush.msra.mxu2 %v1255_v41 }
  0x1c   :  { %977 = vmatmul.msk.f32.gmra.mxu0 %vm138_vm2, %v38_v7 }
  0x1d   :  { %626 = vmatpush.msra.mxu2 %v1264_v43 }
  0x24   :  { %978 = vmatmul.msk.f32.gmra.mxu0 %vm138_vm2, %v39_v10 }
  0x2c   :  { %979 = vmatmul.msk.f32.gmra.mxu0 %vm138_vm2, %v40_v13 }
  0x34   :  { %980 = vmatmul.msk.f32.gmra.mxu0 %vm138_vm2, %v41_v17 }
  0x77   :  { %v47_v12 = vpop.xlane.xlu0 %46 }
  0x78   :  { %v51_v26 = vsub.f32 %v43_v0, %v47_v12 }
  0x7f   :  { %v50_v14 = vpop.xlane.xlu0 %49 }
  0x80   :  { %v52_v15 = vsub.f32 %v50_v14, %v47_v12 }
  0x81   :  { %v184_v47 = vpop.f32.mrf.mxu0 }
  0x82   :  { %v53_v16 = vadd.f32 1e-08, %v52_v15 }
  0x84   :  { %1009 = vrcp.f32 %v53_v16  ;;  %v65_v21 = vand.u32 2147483648, %v53_v16  ;;  %v63_v23 = vand.u32 2147483647, %v53_v16  ;;  %vm59_vm4 = vweird.f32 %v53_v16 }
  0x86   :  { %v66_v25 = vor.u32 1.1754944e-38, %v65_v21  ;;  %vm64_vm6 = vcmp.eq.f32.partialorder %v63_v23, 8.507059e+37 }
  0x88   :  { %v205_v50 = vpop.f32.mrf.mxu3 }
  0x89   :  { %v187_v55 = vpop.f32.mrf.mxu0 }
  0x8a   :  { %v1010_v18 = vpop.eup %1009 }
  0x8b   :  { %v55_v19 = vmul.f32 %v1010_v18, %v53_v16  ;;  %vm60_vm3 = vweird.f32 %v1010_v18 }
  0x8c   :  { %vm61_vm5 = vmor %vm59_vm4, %vm60_vm3 }
  0x8d   :  { %v56_v20 = vsub.f32 1.0, %v55_v19 }
  0x8f   :  { %v57_v22 = vmul.f32 %v1010_v18, %v56_v20 }
  0x91   :  { %v58_v24 = vadd.f32 %v1010_v18, %v57_v22  ;;  %v190_v62 = vpop.f32.mrf.mxu0 }
  0x93   :  { %v62_v27 = vsel %vm61_vm5, %v1010_v18, %v58_v24 }
  0x94   :  { %v67_v28 = vsel %vm64_vm6, %v66_v25, %v62_v27 }
  0x95   :  { %v68_v29 = vmul.f32 %v67_v28, %v51_v26  ;;  %v1007_v28 = vld [vmem:[%s1482_s7] ss:$0 sm:$0xff] }
  0x97   :  { %v98_v30 = vperm.slane %v68_v29, 4  ;;  %v84_v31 = vperm.slane %v68_v29, 2  ;;  %v70_v32 = vperm.slane %v68_v29, 0  ;;  %v91_v33 = vperm.slane %v68_v29, 3 }
  0x98   :  { %v77_v34 = vperm.slane %v68_v29, 1  ;;  %v119_v35 = vperm.slane %v68_v29, 7  ;;  %v105_v36 = vperm.slane %v68_v29, 5  ;;  %v112_v37 = vperm.slane %v68_v29, 6  ;;  %v317_v29 = vpop.f32.mrf.mxu2 }
  0x99   :  { %103 = vperm.xlu0 %1004, %v98_v30   ;;  %89 = vperm.xlu2 %1003, %v84_v31   ;;  %v193_v3 = vpop.f32.mrf.mxu0  ;;  %v321_v30 = vrot.slane %v317_v29, 1  ;;  %v325_v42 = vrot.slane %v317_v29, 5 }
  0x9a   :  { %75 = vperm.xlu1 %1002, %v70_v32   ;;  %v322_v32 = vrot.slane %v317_v29, 2 }
  0xa1   :  { %96 = vperm.xlu2 %1003, %v91_v33   ;;  %v196_v8 = vpop.f32.mrf.mxu0 }
  0xa2   :  { %82 = vperm.xlu1 %1002, %v77_v34   ;;  %v323_v34 = vrot.slane %v317_v29, 3 }
  0xa9   :  { %124 = vperm.xlu2 %1003, %v119_v35   ;;  %v199_v13 = vpop.f32.mrf.mxu0 }
  0xaa   :  { %110 = vperm.xlu1 %1002, %v105_v36   ;;  %v324_v36 = vrot.slane %v317_v29, 4 }
  0xb1   :  { %v202_v20 = vpop.f32.mrf.mxu0 }
  0xb2   :  { %117 = vperm.xlu1 %1002, %v112_v37  }
  0xf3   :  { %v90_v45 = vpop.permute.xlu2 %89 }
  0xf4   :  { %v132_v0 = vmul.f32 %v1005_v48, %v90_v45 }
  0xf6   :  { %v191_v2 = vadd.f32 %v190_v62, %v132_v0 }
  0xf8   :  { %v214_v4 = vadd.f32 %v1006_v52, %v191_v2 }
  0xfb   :  { %v97_v46 = vpop.permute.xlu2 %96 }
  0xfc   :  { %v133_v5 = vmul.f32 %v1005_v48, %v97_v46 }
  0xfe   :  { %v194_v6 = vadd.f32 %v193_v3, %v133_v5 }
 0x100   :  { %v215_v9 = vadd.f32 %v1006_v52, %v194_v6 }
 0x103   :  { %v125_v49 = vpop.permute.xlu2 %124 }
 0x104   :  { %v137_v51 = vmul.f32 %v1005_v48, %v125_v49 }
 0x106   :  { %v206_v53 = vadd.f32 %v205_v50, %v137_v51 }
 0x108   :  { %v219_v54 = vadd.f32 %v1006_v52, %v206_v53 }
 0x10a   :  { %989 = vmatmul.msk.f32.vlgmr.msrb.gmra.mxu3 %vm226_vm7, %v219_v54 }
 0x10b   :  { %547 = vmatpush.msrb.mxu3 %v1240_v38  ;;  %v104_v7 = vpop.permute.xlu0 %103 }
 0x10c   :  { %v76_v56 = vpop.permute.xlu1 %75  ;;  %v134_v10 = vmul.f32 %v1005_v48, %v104_v7 }
 0x10d   :  { %v130_v57 = vmul.f32 %v1005_v48, %v76_v56  ;;  %548 = vmatpush.msrb.mxu3 %v1246_v39 }
 0x10e   :  { %v197_v12 = vadd.f32 %v196_v8, %v134_v10 }
 0x10f   :  { %v185_v58 = vadd.f32 %v184_v47, %v130_v57  ;;  %549 = vmatpush.msrb.mxu3 %v1255_v41 }
 0x110   :  { %v216_v14 = vadd.f32 %v1006_v52, %v197_v12 }
 0x111   :  { %v212_v59 = vadd.f32 %v1006_v52, %v185_v58  ;;  %550 = vmatpush.msrb.mxu3 %v1264_v43  ;;  %v326_v58 = vrot.slane %v317_v29, 6 }
 0x113   :  { %982 = vmatmul.msk.f32.vlgmr.msra.gmra.mxu1 %vm226_vm7, %v212_v59 }
 0x114   :  { %v83_v60 = vpop.permute.xlu1 %82 }
 0x115   :  { %v131_v61 = vmul.f32 %v1005_v48, %v83_v60 }
 0x117   :  { %v188_v63 = vadd.f32 %v187_v55, %v131_v61 }
 0x119   :  { %v213_v1 = vadd.f32 %v1006_v52, %v188_v63 }
 0x11b   :  { %983 = vmatmul.msk.f32.gmra.mxu1 %vm226_vm7, %v213_v1 }
 0x11c   :  { %v111_v11 = vpop.permute.xlu1 %110 }
 0x11d   :  { %v135_v15 = vmul.f32 %v1005_v48, %v111_v11 }
 0x11f   :  { %v200_v16 = vadd.f32 %v199_v13, %v135_v15 }
 0x121   :  { %v217_v18 = vadd.f32 %v1006_v52, %v200_v16 }
 0x123   :  { %984 = vmatmul.msk.f32.gmra.mxu1 %vm226_vm7, %v214_v4 }
 0x124   :  { %v118_v17 = vpop.permute.xlu1 %117 }
 0x125   :  { %v136_v19 = vmul.f32 %v1005_v48, %v118_v17 }
 0x127   :  { %v203_v21 = vadd.f32 %v202_v20, %v136_v19 }
 0x129   :  { %v218_v22 = vadd.f32 %v1006_v52, %v203_v21  ;;  %v327_v52 = vrot.slane %v317_v29, 7 }
 0x12b   :  { %985 = vmatmul.msk.f32.gmra.mxu1 %vm226_vm7, %v215_v9 }
 0x133   :  { %986 = vmatmul.msk.f32.gmra.mxu1 %vm226_vm7, %v216_v14 }
 0x13b   :  { %987 = vmatmul.msk.f32.gmra.mxu1 %vm226_vm7, %v217_v18 }
 0x143   :  { %988 = vmatmul.msk.f32.gmra.mxu1 %vm226_vm7, %v218_v22 }
 0x18d   :  { %v289_v45 = vpop.f32.mrf.mxu3 }
 0x18e   :  { %v1316_v51 = vadd.f32 %v1007_v28, %v289_v45 }
 0x190   :  { %v268_v23 = vpop.f32.mrf.mxu1  ;;  %v343_v56 = vadd.f32 %v327_v52, %v1316_v51 }
 0x191   :  { %v1312_v48 = vadd.f32 %v1007_v28, %v268_v23 }
 0x193   :  { %v336_v54 = vadd.f32 %v317_v29, %v1312_v48 }
 0x198   :  { %v271_v24 = vpop.f32.mrf.mxu1 }
 0x199   :  { %v1300_v31 = vadd.f32 %v1007_v28, %v271_v24 }
 0x19b   :  { %v337_v44 = vadd.f32 %v321_v30, %v1300_v31 }
 0x19d   :  { %1011 = vtanh.f32 %v337_v44 }
 0x1a0   :  { %v274_v25 = vpop.f32.mrf.mxu1 }
 0x1a1   :  { %v1302_v33 = vadd.f32 %v1007_v28, %v274_v25 }
 0x1a3   :  { %v338_v47 = vadd.f32 %v322_v32, %v1302_v33  ;;  %v1012_v59 = vpop.eup %1011 }
 0x1a4   :  { %v360_v0 = vrot.slane %v1012_v59, 7 }
 0x1a5   :  { %1013 = vtanh.f32 %v338_v47 }
 0x1a8   :  { %v277_v26 = vpop.f32.mrf.mxu1 }
 0x1a9   :  { %v1304_v35 = vadd.f32 %v1007_v28, %v277_v26 }
 0x1ab   :  { %v339_v49 = vadd.f32 %v323_v34, %v1304_v35  ;;  %v1014_v60 = vpop.eup %1013 }
 0x1ac   :  { %v363_v2 = vrot.slane %v1014_v60, 6 }
 0x1ad   :  { %1015 = vtanh.f32 %v339_v49 }
 0x1b0   :  { %v280_v27 = vpop.f32.mrf.mxu1 }
 0x1b1   :  { %v1306_v37 = vadd.f32 %v1007_v28, %v280_v27 }
 0x1b3   :  { %v340_v50 = vadd.f32 %v324_v36, %v1306_v37  ;;  %v1016_v62 = vpop.eup %1015 }
 0x1b4   :  { %v366_v3 = vrot.slane %v1016_v62, 5 }
 0x1b5   :  { %1017 = vtanh.f32 %v340_v50 }
 0x1b8   :  { %v283_v40 = vpop.f32.mrf.mxu1 }
 0x1b9   :  { %v1309_v46 = vadd.f32 %v1007_v28, %v283_v40 }
 0x1bb   :  { %v341_v53 = vadd.f32 %v325_v42, %v1309_v46  ;;  %v1018_v63 = vpop.eup %1017 }
 0x1bc   :  { %v369_v5 = vrot.slane %v1018_v63, 4 }
 0x1bd   :  { %1019 = vtanh.f32 %v341_v53 }
 0x1be   :  { %1021 = vtanh.f32 %v336_v54 }
 0x1bf   :  { %1023 = vtanh.f32 %v343_v56 }
 0x1c0   :  { %v286_v55 = vpop.f32.mrf.mxu1 }
 0x1c1   :  { %v1321_v57 = vadd.f32 %v1007_v28, %v286_v55 }
 0x1c3   :  { %v342_v61 = vadd.f32 %v326_v58, %v1321_v57  ;;  %v1020_v1 = vpop.eup %1019 }
 0x1c4   :  { %v1022_v4 = vpop.eup %1021  ;;  %v372_v7 = vrot.slane %v1020_v1, 3 }
 0x1c5   :  { %1025 = vtanh.f32 %v342_v61  ;;  %v362_v6 = vsel %vm361_vm8, %v360_v0, %v1022_v4  ;;  %v1024_v8 = vpop.eup %1023 }
 0x1c6   :  { %v365_v9 = vsel %vm364_vm9, %v363_v2, %v362_v6  ;;  %v378_v15 = vrot.slane %v1024_v8, 1 }
 0x1c7   :  { %v368_v11 = vsel %vm367_vm10, %v366_v3, %v365_v9 }
 0x1c8   :  { %v371_v12 = vsel %vm370_vm11, %v369_v5, %v368_v11 }
 0x1c9   :  { %v374_v14 = vsel %vm373_vm12, %v372_v7, %v371_v12 }
 0x1cb   :  { %v1026_v10 = vpop.eup %1025 }
 0x1cc   :  { %v375_v13 = vrot.slane %v1026_v10, 2 }
 0x1ce   :  { %v377_v16 = vsel %vm376_vm13, %v375_v13, %v374_v14 }
 0x1cf   :  { %v380_v17 = vsel %vm379_vm14, %v378_v15, %v377_v16 }
 0x1d0   :  { %990 = vmatmul.msk.f32.vlgmr.msra.gmra.mxu3 %vm296_vm15, %v380_v17 }
 0x1d1   :  { %699 = vmatpush.msra.mxu3 %v1240_v38 }
 0x1d3   :  { %700 = vmatpush.msra.mxu3 %v1246_v39 }
 0x1d5   :  { %701 = vmatpush.msra.mxu3 %v1255_v41 }
 0x1d7   :  { %702 = vmatpush.msra.mxu3 %v1264_v43 }
 0x253   :  { %v400_v18 = vpop.f32.mrf.mxu3 }
 0x254   :  { %v404_v19 = vrot.slane %v400_v18, 7  ;;  %v405_v20 = vrot.slane %v400_v18, 1  ;;  %v406_v21 = vrot.slane %v400_v18, 2  ;;  %v420_v22 = vadd.f32 %v400_v18, %v1300_v31 }
 0x255   :  { %v407_v23 = vrot.slane %v400_v18, 3  ;;  %v408_v24 = vrot.slane %v400_v18, 4  ;;  %v409_v25 = vrot.slane %v400_v18, 5  ;;  %v410_v27 = vrot.slane %v400_v18, 6 }
 0x256   :  { %v419_v26 = vadd.f32 %v404_v19, %v1312_v48  ;;  %v421_v28 = vadd.f32 %v405_v20, %v1302_v33  ;;  %v422_v29 = vadd.f32 %v406_v21, %v1304_v35  ;;  %1027 = vtanh.f32 %v420_v22 }
 0x257   :  { %v423_v30 = vadd.f32 %v407_v23, %v1306_v37  ;;  %v424_v32 = vadd.f32 %v408_v24, %v1309_v46  ;;  %v425_v34 = vadd.f32 %v409_v25, %v1321_v57  ;;  %v426_v36 = vadd.f32 %v410_v27, %v1316_v51 }
 0x258   :  { %1029 = vtanh.f32 %v419_v26 }
 0x259   :  { %1031 = vtanh.f32 %v421_v28 }
 0x25a   :  { %1033 = vtanh.f32 %v422_v29 }
 0x25b   :  { %1035 = vtanh.f32 %v423_v30 }
 0x25c   :  { %1037 = vtanh.f32 %v424_v32  ;;  %v1028_v40 = vpop.eup %1027 }
 0x25d   :  { %1039 = vtanh.f32 %v425_v34 }
 0x25e   :  { %v1030_v42 = vpop.eup %1029  ;;  %1041 = vtanh.f32 %v426_v36 }
 0x25f   :  { %v1032_v44 = vpop.eup %1031  ;;  %v443_v45 = vrot.slane %v1030_v42, 1 }
 0x260   :  { %v1034_v47 = vpop.eup %1033  ;;  %v445_v49 = vrot.slane %v1032_v44, 7 }
 0x261   :  { %v1036_v50 = vpop.eup %1035  ;;  %v444_v52 = vsel %vm361_vm8, %v1028_v40, %v443_v45  ;;  %v447_v53 = vrot.slane %v1034_v47, 6 }
 0x262   :  { %v1038_v54 = vpop.eup %1037  ;;  %v446_v55 = vsel %vm364_vm9, %v445_v49, %v444_v52  ;;  %v449_v56 = vrot.slane %v1036_v50, 5 }
 0x263   :  { %v1040_v58 = vpop.eup %1039  ;;  %v448_v59 = vsel %vm367_vm10, %v447_v53, %v446_v55  ;;  %v451_v60 = vrot.slane %v1038_v54, 4 }
 0x264   :  { %v1042_v61 = vpop.eup %1041  ;;  %v450_v62 = vsel %vm370_vm11, %v449_v56, %v448_v59  ;;  %v453_v63 = vrot.slane %v1040_v58, 3 }
 0x265   :  { %v452_v0 = vsel %vm373_vm12, %v451_v60, %v450_v62  ;;  %v455_v1 = vrot.slane %v1042_v61, 2 }
 0x266   :  { %v454_v2 = vsel %vm376_vm13, %v453_v63, %v452_v0 }
 0x267   :  { %v456_v3 = vsel %vm379_vm14, %v455_v1, %v454_v2 }
 0x268   :  { %991 = vmatmul.msk.f32.vlgmr.msrb.gmra.mxu2 %vm296_vm15, %v456_v3 }
 0x269   :  { %775 = vmatpush.msrb.mxu2 %v1240_v38 }
 0x26b   :  { %776 = vmatpush.msrb.mxu2 %v1246_v39 }
 0x26d   :  { %777 = vmatpush.msrb.mxu2 %v1255_v41 }
 0x26f   :  { %778 = vmatpush.msrb.mxu2 %v1264_v43 }
 0x2eb   :  { %v476_v4 = vpop.f32.mrf.mxu2 }
 0x2ec   :  { %v480_v5 = vrot.slane %v476_v4, 6  ;;  %v481_v6 = vrot.slane %v476_v4, 7  ;;  %v482_v7 = vrot.slane %v476_v4, 1  ;;  %v483_v8 = vrot.slane %v476_v4, 2 }
 0x2ed   :  { %v497_v9 = vadd.f32 %v476_v4, %v1302_v33  ;;  %v484_v10 = vrot.slane %v476_v4, 3  ;;  %v485_v11 = vrot.slane %v476_v4, 4  ;;  %v486_v14 = vrot.slane %v476_v4, 5 }
 0x2ee   :  { %v495_v12 = vadd.f32 %v480_v5, %v1312_v48  ;;  %v496_v13 = vadd.f32 %v481_v6, %v1300_v31  ;;  %v498_v15 = vadd.f32 %v482_v7, %v1304_v35  ;;  %v499_v16 = vadd.f32 %v483_v8, %v1306_v37 }
 0x2ef   :  { %1043 = vtanh.f32 %v497_v9  ;;  %v500_v17 = vadd.f32 %v484_v10, %v1309_v46  ;;  %v501_v18 = vadd.f32 %v485_v11, %v1321_v57  ;;  %v502_v19 = vadd.f32 %v486_v14, %v1316_v51 }
 0x2f0   :  { %1045 = vtanh.f32 %v495_v12 }
 0x2f1   :  { %1047 = vtanh.f32 %v496_v13 }
 0x2f2   :  { %1049 = vtanh.f32 %v498_v15 }
 0x2f3   :  { %1051 = vtanh.f32 %v499_v16 }
 0x2f4   :  { %1053 = vtanh.f32 %v500_v17 }
 0x2f5   :  { %v1044_v20 = vpop.eup %1043  ;;  %1055 = vtanh.f32 %v501_v18 }
 0x2f6   :  { %v1046_v21 = vpop.eup %1045  ;;  %1057 = vtanh.f32 %v502_v19 }
 0x2f7   :  { %v1048_v22 = vpop.eup %1047  ;;  %v519_v23 = vrot.slane %v1046_v21, 2 }
 0x2f8   :  { %v1050_v24 = vpop.eup %1049  ;;  %v520_v25 = vrot.slane %v1048_v22, 1 }
 0x2f9   :  { %v1052_v26 = vpop.eup %1051  ;;  %v523_v29 = vrot.slane %v1050_v24, 7 }
 0x2fa   :  { %v1054_v27 = vpop.eup %1053  ;;  %v521_v28 = vsel %vm361_vm8, %v520_v25, %v519_v23  ;;  %v525_v34 = vrot.slane %v1052_v26, 6 }
 0x2fb   :  { %v1056_v30 = vpop.eup %1055  ;;  %v522_v32 = vsel %vm364_vm9, %v1044_v20, %v521_v28  ;;  %v527_v42 = vrot.slane %v1054_v27, 5 }
 0x2fc   :  { %v1058_v36 = vpop.eup %1057  ;;  %v524_v40 = vsel %vm367_vm10, %v523_v29, %v522_v32  ;;  %v529_v45 = vrot.slane %v1056_v30, 4 }
 0x2fd   :  { %v526_v44 = vsel %vm370_vm11, %v525_v34, %v524_v40  ;;  %v531_v49 = vrot.slane %v1058_v36, 3 }
 0x2fe   :  { %v528_v47 = vsel %vm373_vm12, %v527_v42, %v526_v44 }
 0x2ff   :  { %v530_v50 = vsel %vm376_vm13, %v529_v45, %v528_v47 }
 0x300   :  { %v532_v52 = vsel %vm379_vm14, %v531_v49, %v530_v50 }
 0x301   :  { %992 = vmatmul.msk.f32.vlgmr.msrb.gmra.mxu3 %vm296_vm15, %v532_v52 }
 0x302   :  { %851 = vmatpush.msrb.mxu3 %v1240_v38 }
 0x304   :  { %852 = vmatpush.msrb.mxu3 %v1246_v39 }
 0x306   :  { %853 = vmatpush.msrb.mxu3 %v1255_v41 }
 0x308   :  { %854 = vmatpush.msrb.mxu3 %v1264_v43 }
 0x384   :  { %v552_v53 = vpop.f32.mrf.mxu3 }
 0x385   :  { %v556_v54 = vrot.slane %v552_v53, 5  ;;  %v557_v55 = vrot.slane %v552_v53, 6  ;;  %v558_v56 = vrot.slane %v552_v53, 7  ;;  %v559_v58 = vrot.slane %v552_v53, 1 }
 0x386   :  { %v574_v59 = vadd.f32 %v552_v53, %v1304_v35  ;;  %v560_v60 = vrot.slane %v552_v53, 2  ;;  %v561_v61 = vrot.slane %v552_v53, 3  ;;  %v562_v39 = vrot.slane %v552_v53, 4 }
 0x387   :  { %v571_v62 = vadd.f32 %v556_v54, %v1312_v48  ;;  %v572_v63 = vadd.f32 %v557_v55, %v1300_v31  ;;  %v573_v38 = vadd.f32 %v558_v56, %v1302_v33  ;;  %v575_v41 = vadd.f32 %v559_v58, %v1306_v37 }
 0x388   :  { %1059 = vtanh.f32 %v574_v59  ;;  %v576_v43 = vadd.f32 %v560_v60, %v1309_v46  ;;  %v577_v0 = vadd.f32 %v561_v61, %v1321_v57  ;;  %v578_v1 = vadd.f32 %v562_v39, %v1316_v51 }
 0x389   :  { %1061 = vtanh.f32 %v571_v62 }
 0x38a   :  { %1063 = vtanh.f32 %v572_v63 }
 0x38b   :  { %1065 = vtanh.f32 %v573_v38 }
 0x38c   :  { %1067 = vtanh.f32 %v575_v41 }
 0x38d   :  { %1069 = vtanh.f32 %v576_v43 }
 0x38e   :  { %v1060_v2 = vpop.eup %1059  ;;  %1071 = vtanh.f32 %v577_v0 }
 0x38f   :  { %v1062_v3 = vpop.eup %1061  ;;  %1073 = vtanh.f32 %v578_v1 }
 0x390   :  { %v1064_v4 = vpop.eup %1063  ;;  %v595_v5 = vrot.slane %v1062_v3, 3 }
 0x391   :  { %v1066_v6 = vpop.eup %1065  ;;  %v596_v7 = vrot.slane %v1064_v4, 2 }
 0x392   :  { %v1068_v8 = vpop.eup %1067  ;;  %v598_v9 = vrot.slane %v1066_v6, 1 }
 0x393   :  { %v1070_v10 = vpop.eup %1069  ;;  %v597_v11 = vsel %vm361_vm8, %v596_v7, %v595_v5  ;;  %v601_v14 = vrot.slane %v1068_v8, 7 }
 0x394   :  { %v1072_v12 = vpop.eup %1071  ;;  %v599_v13 = vsel %vm364_vm9, %v598_v9, %v597_v11  ;;  %v603_v17 = vrot.slane %v1070_v10, 6 }
 0x395   :  { %v1074_v15 = vpop.eup %1073  ;;  %v600_v16 = vsel %vm367_vm10, %v1060_v2, %v599_v13  ;;  %v605_v19 = vrot.slane %v1072_v12, 5 }
 0x396   :  { %v602_v18 = vsel %vm370_vm11, %v601_v14, %v600_v16  ;;  %v607_v21 = vrot.slane %v1074_v15, 4 }
 0x397   :  { %v604_v20 = vsel %vm373_vm12, %v603_v17, %v602_v18 }
 0x398   :  { %v606_v22 = vsel %vm376_vm13, %v605_v19, %v604_v20 }
 0x399   :  { %v608_v23 = vsel %vm379_vm14, %v607_v21, %v606_v22 }
 0x39a   :  { %993 = vmatmul.msk.f32.vlgmr.msra.gmra.mxu2 %vm296_vm15, %v608_v23 }
 0x41d   :  { %v628_v24 = vpop.f32.mrf.mxu2 }
 0x41e   :  { %v632_v25 = vrot.slane %v628_v24, 4  ;;  %v633_v26 = vrot.slane %v628_v24, 5  ;;  %v634_v27 = vrot.slane %v628_v24, 6  ;;  %v635_v28 = vrot.slane %v628_v24, 7 }
 0x41f   :  { %v651_v29 = vadd.f32 %v628_v24, %v1306_v37  ;;  %v636_v30 = vrot.slane %v628_v24, 1  ;;  %v637_v32 = vrot.slane %v628_v24, 2  ;;  %v638_v42 = vrot.slane %v628_v24, 3 }
 0x420   :  { %v647_v34 = vadd.f32 %v632_v25, %v1312_v48  ;;  %v648_v36 = vadd.f32 %v633_v26, %v1300_v31  ;;  %v649_v40 = vadd.f32 %v634_v27, %v1302_v33  ;;  %v650_v44 = vadd.f32 %v635_v28, %v1304_v35 }
 0x421   :  { %1075 = vtanh.f32 %v651_v29  ;;  %v652_v45 = vadd.f32 %v636_v30, %v1309_v46  ;;  %v653_v47 = vadd.f32 %v637_v32, %v1321_v57  ;;  %v654_v49 = vadd.f32 %v638_v42, %v1316_v51 }
 0x422   :  { %1077 = vtanh.f32 %v647_v34 }
 0x423   :  { %1079 = vtanh.f32 %v648_v36 }
 0x424   :  { %1081 = vtanh.f32 %v649_v40 }
 0x425   :  { %1083 = vtanh.f32 %v650_v44 }
 0x426   :  { %1085 = vtanh.f32 %v652_v45 }
 0x427   :  { %v1076_v50 = vpop.eup %1075  ;;  %1087 = vtanh.f32 %v653_v47 }
 0x428   :  { %v1078_v52 = vpop.eup %1077  ;;  %1089 = vtanh.f32 %v654_v49 }
 0x429   :  { %v1080_v53 = vpop.eup %1079  ;;  %v671_v54 = vrot.slane %v1078_v52, 4 }
 0x42a   :  { %v1082_v55 = vpop.eup %1081  ;;  %v672_v56 = vrot.slane %v1080_v53, 3 }
 0x42b   :  { %v1084_v58 = vpop.eup %1083  ;;  %v674_v59 = vrot.slane %v1082_v55, 2 }
 0x42c   :  { %v1086_v60 = vpop.eup %1085  ;;  %v673_v61 = vsel %vm361_vm8, %v672_v56, %v671_v54  ;;  %v676_v62 = vrot.slane %v1084_v58, 1 }
 0x42d   :  { %v1088_v63 = vpop.eup %1087  ;;  %v675_v38 = vsel %vm364_vm9, %v674_v59, %v673_v61  ;;  %v679_v43 = vrot.slane %v1086_v60, 7 }
 0x42e   :  { %v1090_v39 = vpop.eup %1089  ;;  %v677_v41 = vsel %vm367_vm10, %v676_v62, %v675_v38  ;;  %v681_v1 = vrot.slane %v1088_v63, 6 }
 0x42f   :  { %v678_v0 = vsel %vm370_vm11, %v1076_v50, %v677_v41  ;;  %v683_v3 = vrot.slane %v1090_v39, 5 }
 0x430   :  { %v680_v2 = vsel %vm373_vm12, %v679_v43, %v678_v0 }
 0x431   :  { %v682_v4 = vsel %vm376_vm13, %v681_v1, %v680_v2 }
 0x432   :  { %v684_v5 = vsel %vm379_vm14, %v683_v3, %v682_v4 }
 0x433   :  { %994 = vmatmul.msk.f32.vlgmr.msra.gmra.mxu3 %vm296_vm15, %v684_v5 }
 0x4b6   :  { %v704_v6 = vpop.f32.mrf.mxu3 }
 0x4b7   :  { %v708_v7 = vrot.slane %v704_v6, 3  ;;  %v709_v8 = vrot.slane %v704_v6, 4  ;;  %v710_v9 = vrot.slane %v704_v6, 5  ;;  %v711_v10 = vrot.slane %v704_v6, 6 }
 0x4b8   :  { %v712_v11 = vrot.slane %v704_v6, 7  ;;  %v713_v12 = vrot.slane %v704_v6, 1  ;;  %v714_v16 = vrot.slane %v704_v6, 2  ;;  %v728_v21 = vadd.f32 %v704_v6, %v1309_v46 }
 0x4b9   :  { %v723_v13 = vadd.f32 %v708_v7, %v1312_v48  ;;  %v724_v14 = vadd.f32 %v709_v8, %v1300_v31  ;;  %v725_v15 = vadd.f32 %v710_v9, %v1302_v33  ;;  %v726_v17 = vadd.f32 %v711_v10, %v1304_v35 }
 0x4ba   :  { %v727_v18 = vadd.f32 %v712_v11, %v1306_v37  ;;  %v729_v19 = vadd.f32 %v713_v12, %v1321_v57  ;;  %v730_v20 = vadd.f32 %v714_v16, %v1316_v51 }
 0x4bb   :  { %1091 = vtanh.f32 %v723_v13 }
 0x4bc   :  { %1093 = vtanh.f32 %v724_v14 }
 0x4bd   :  { %1095 = vtanh.f32 %v725_v15 }
 0x4be   :  { %1097 = vtanh.f32 %v726_v17 }
 0x4bf   :  { %1099 = vtanh.f32 %v727_v18 }
 0x4c0   :  { %1101 = vtanh.f32 %v729_v19 }
 0x4c1   :  { %v1092_v22 = vpop.eup %1091  ;;  %1103 = vtanh.f32 %v730_v20 }
 0x4c2   :  { %v1094_v23 = vpop.eup %1093  ;;  %1105 = vtanh.f32 %v728_v21  ;;  %v747_v24 = vrot.slane %v1092_v22, 5 }
 0x4c3   :  { %v1096_v25 = vpop.eup %1095  ;;  %v748_v26 = vrot.slane %v1094_v23, 4 }
 0x4c4   :  { %v1098_v27 = vpop.eup %1097  ;;  %v750_v28 = vrot.slane %v1096_v25, 3 }
 0x4c5   :  { %v1100_v29 = vpop.eup %1099  ;;  %v749_v30 = vsel %vm361_vm8, %v748_v26, %v747_v24  ;;  %v752_v32 = vrot.slane %v1098_v27, 2  ;;  %v894_v26 = vld [vmem:[%s1486_s8 + $0x18] sm:$0xff]  ;;  %v893_v27 = vld [vmem:[%s1486_s8 + $0x10] sm:$0xff] }
 0x4c6   :  { %v1102_v34 = vpop.eup %1101  ;;  %v751_v36 = vsel %vm364_vm9, %v750_v28, %v749_v30  ;;  %v754_v40 = vrot.slane %v1100_v29, 1  ;;  %935 = vmatpush.msra.mxu2 %v894_v26  ;;  %v892_v28 = vld [vmem:[%s1486_s8 + $0x8] sm:$0xff]  ;;  %v891_v29 = vld [vmem:[%s1486_s8] sm:$0xff] }
 0x4c7   :  { %v1104_v42 = vpop.eup %1103  ;;  %v753_v44 = vsel %vm367_vm10, %v752_v32, %v751_v36  ;;  %v757_v49 = vrot.slane %v1102_v34, 7 }
 0x4c8   :  { %v1106_v45 = vpop.eup %1105  ;;  %v755_v47 = vsel %vm370_vm11, %v754_v40, %v753_v44  ;;  %v759_v52 = vrot.slane %v1104_v42, 6  ;;  %936 = vmatpush.msra.mxu2 %v893_v27 }
 0x4c9   :  { %v756_v50 = vsel %vm373_vm12, %v1106_v45, %v755_v47 }
 0x4ca   :  { %v758_v53 = vsel %vm376_vm13, %v757_v49, %v756_v50  ;;  %937 = vmatpush.msra.mxu2 %v892_v28 }
 0x4cb   :  { %v760_v54 = vsel %vm379_vm14, %v759_v52, %v758_v53 }
 0x4cc   :  { %995 = vmatmul.msk.f32.vlgmr.msrb.gmra.mxu2 %vm296_vm15, %v760_v54 }
 0x4cd   :  { %938 = vmatpush.msra.mxu2 %v891_v29 }
 0x54f   :  { %v780_v55 = vpop.f32.mrf.mxu2 }
 0x550   :  { %v784_v56 = vrot.slane %v780_v55, 2  ;;  %v785_v58 = vrot.slane %v780_v55, 3  ;;  %v786_v59 = vrot.slane %v780_v55, 4  ;;  %v787_v60 = vrot.slane %v780_v55, 5 }
 0x551   :  { %v788_v61 = vrot.slane %v780_v55, 6  ;;  %v789_v62 = vrot.slane %v780_v55, 7  ;;  %v790_v41 = vrot.slane %v780_v55, 1  ;;  %v805_v3 = vadd.f32 %v780_v55, %v1321_v57 }
 0x552   :  { %v799_v63 = vadd.f32 %v784_v56, %v1312_v48  ;;  %v800_v38 = vadd.f32 %v785_v58, %v1300_v31  ;;  %v801_v39 = vadd.f32 %v786_v59, %v1302_v33  ;;  %v802_v43 = vadd.f32 %v787_v60, %v1304_v35 }
 0x553   :  { %v803_v0 = vadd.f32 %v788_v61, %v1306_v37  ;;  %v804_v1 = vadd.f32 %v789_v62, %v1309_v46  ;;  %v806_v2 = vadd.f32 %v790_v41, %v1316_v51 }
 0x554   :  { %1107 = vtanh.f32 %v799_v63 }
 0x555   :  { %1109 = vtanh.f32 %v800_v38 }
 0x556   :  { %1111 = vtanh.f32 %v801_v39 }
 0x557   :  { %1113 = vtanh.f32 %v802_v43 }
 0x558   :  { %1115 = vtanh.f32 %v803_v0 }
 0x559   :  { %1117 = vtanh.f32 %v804_v1 }
 0x55a   :  { %v1108_v4 = vpop.eup %1107  ;;  %1119 = vtanh.f32 %v806_v2 }
 0x55b   :  { %v1110_v5 = vpop.eup %1109  ;;  %v823_v6 = vrot.slane %v1108_v4, 6  ;;  %1121 = vtanh.f32 %v805_v3  ;;  %v1008_v4 = vld [vmem:[%s1485_s9] ss:$0 sm:$0xff] }
 0x55c   :  { %v1112_v7 = vpop.eup %1111  ;;  %v824_v8 = vrot.slane %v1110_v5, 5 }
 0x55d   :  { %v1114_v9 = vpop.eup %1113  ;;  %v826_v10 = vrot.slane %v1112_v7, 4 }
 0x55e   :  { %v1116_v11 = vpop.eup %1115  ;;  %v825_v12 = vsel %vm361_vm8, %v824_v8, %v823_v6  ;;  %v828_v13 = vrot.slane %v1114_v9, 3 }
 0x55f   :  { %v1118_v14 = vpop.eup %1117  ;;  %v827_v15 = vsel %vm364_vm9, %v826_v10, %v825_v12  ;;  %v830_v16 = vrot.slane %v1116_v11, 2 }
 0x560   :  { %v1120_v17 = vpop.eup %1119  ;;  %v829_v18 = vsel %vm367_vm10, %v828_v13, %v827_v15  ;;  %v832_v19 = vrot.slane %v1118_v14, 1 }
 0x561   :  { %v831_v20 = vsel %vm370_vm11, %v830_v16, %v829_v18  ;;  %v1122_v21 = vpop.eup %1121  ;;  %v835_v23 = vrot.slane %v1120_v17, 7 }
 0x562   :  { %v833_v22 = vsel %vm373_vm12, %v832_v19, %v831_v20 }
 0x563   :  { %v834_v24 = vsel %vm376_vm13, %v1122_v21, %v833_v22 }
 0x564   :  { %v836_v25 = vsel %vm379_vm14, %v835_v23, %v834_v24 }
 0x565   :  { %996 = vmatmul.msk.f32.vlgmr.msrb.gmra.mxu3 %vm296_vm15, %v836_v25 }
 0x5e8   :  { %v856_v30 = vpop.f32.mrf.mxu3 }
 0x5e9   :  { %v860_v32 = vrot.slane %v856_v30, 1  ;;  %v861_v34 = vrot.slane %v856_v30, 2  ;;  %v862_v36 = vrot.slane %v856_v30, 3  ;;  %v863_v40 = vrot.slane %v856_v30, 4 }
 0x5ea   :  { %v864_v42 = vrot.slane %v856_v30, 5  ;;  %v865_v44 = vrot.slane %v856_v30, 6  ;;  %v866_v45 = vrot.slane %v856_v30, 7  ;;  %v882_v56 = vadd.f32 %v856_v30, %v1316_v51 }
 0x5eb   :  { %v875_v47 = vadd.f32 %v860_v32, %v1312_v48  ;;  %v876_v49 = vadd.f32 %v861_v34, %v1300_v31  ;;  %v877_v50 = vadd.f32 %v862_v36, %v1302_v33  ;;  %v878_v52 = vadd.f32 %v863_v40, %v1304_v35 }
 0x5ec   :  { %v879_v53 = vadd.f32 %v864_v42, %v1306_v37  ;;  %v880_v54 = vadd.f32 %v865_v44, %v1309_v46  ;;  %v881_v55 = vadd.f32 %v866_v45, %v1321_v57 }
 0x5ed   :  { %1123 = vtanh.f32 %v875_v47 }
 0x5ee   :  { %1125 = vtanh.f32 %v876_v49 }
 0x5ef   :  { %1127 = vtanh.f32 %v877_v50 }
 0x5f0   :  { %1129 = vtanh.f32 %v878_v52 }
 0x5f1   :  { %1131 = vtanh.f32 %v879_v53 }
 0x5f2   :  { %1133 = vtanh.f32 %v880_v54 }
 0x5f3   :  { %v1124_v48 = vpop.eup %1123  ;;  %1135 = vtanh.f32 %v881_v55 }
 0x5f4   :  { %v1126_v31 = vpop.eup %1125  ;;  %v907_v33 = vrot.slane %v1124_v48, 7  ;;  %1137 = vtanh.f32 %v882_v56 }
 0x5f5   :  { %v1128_v58 = vpop.eup %1127  ;;  %v908_v35 = vrot.slane %v1126_v31, 6 }
 0x5f6   :  { %v1130_v59 = vpop.eup %1129  ;;  %v910_v37 = vrot.slane %v1128_v58, 5 }
 0x5f7   :  { %v1132_v60 = vpop.eup %1131  ;;  %v909_v46 = vsel %vm361_vm8, %v908_v35, %v907_v33  ;;  %v912_v61 = vrot.slane %v1130_v59, 4 }
 0x5f8   :  { %v1134_v62 = vpop.eup %1133  ;;  %v911_v57 = vsel %vm364_vm9, %v910_v37, %v909_v46  ;;  %v914_v63 = vrot.slane %v1132_v60, 3 }
 0x5f9   :  { %v1136_v38 = vpop.eup %1135  ;;  %v913_v51 = vsel %vm367_vm10, %v912_v61, %v911_v57  ;;  %v916_v39 = vrot.slane %v1134_v62, 2 }
 0x5fa   :  { %v915_v41 = vsel %vm370_vm11, %v914_v63, %v913_v51  ;;  %v918_v43 = vrot.slane %v1136_v38, 1  ;;  %v1138_v1 = vpop.eup %1137 }
 0x5fb   :  { %v917_v0 = vsel %vm373_vm12, %v916_v39, %v915_v41 }
 0x5fc   :  { %v919_v2 = vsel %vm376_vm13, %v918_v43, %v917_v0 }
 0x5fd   :  { %v920_v3 = vsel %vm379_vm14, %v1138_v1, %v919_v2 }
 0x5fe   :  { %997 = vmatmul.msk.f32.vlgmr.msra.gmra.mxu2 %vm296_vm15, %v920_v3 }
 0x681   :  { %v940_v5 = vpop.f32.mrf.mxu2 }
 0x682   :  { %v941_v6 = vadd.f32 %v1008_v4, %v940_v5 }
 0x684   :  { %v944_v7 = vsel %vm943_vm0, %v941_v6, -inf }
 0x685   :  { %945 = vmax.xlane.f32.xlu2 %v944_v7 }
 0x6f8   :  { %v946_v8 = vpop.xlane.xlu2 %945 }
 0x6f9   :  { %v947_v9 = vsub.f32 %v941_v6, %v946_v8 }
 0x6fb   :  { %v948_v10 = vmul.f32 1.442695, %v947_v9 }
 0x6fd   :  { %1139 = vpow2.f32 %v948_v10 }
 0x703   :  { %v1140_v11 = vpop.eup %1139 }
 0x704   :  { %v950_v12 = vsel %vm943_vm0, %v1140_v11, 0.0 }
 0x705   :  { %951 = vadd.xlane.f32.xlu1 %v950_v12 }
 0x778   :  { %v952_v13 = vpop.xlane.xlu1 %951 }
 0x779   :  { %1141 = vrcp.f32 %v952_v13  ;;  %v964_v17 = vand.u32 2147483648, %v952_v13  ;;  %v962_v19 = vand.u32 2147483647, %v952_v13  ;;  %vm958_vm2 = vweird.f32 %v952_v13 }
 0x77b   :  { %v965_v21 = vor.u32 1.1754944e-38, %v964_v17  ;;  %vm963_vm4 = vcmp.eq.f32.partialorder %v962_v19, 8.507059e+37 }
 0x77f   :  { %v1142_v14 = vpop.eup %1141 }
 0x780   :  { %v954_v15 = vmul.f32 %v1142_v14, %v952_v13  ;;  %vm959_vm1 = vweird.f32 %v1142_v14 }
 0x781   :  { %vm960_vm3 = vmor %vm958_vm2, %vm959_vm1 }
 0x782   :  { %v955_v16 = vsub.f32 1.0, %v954_v15 }
 0x784   :  { %v956_v18 = vmul.f32 %v1142_v14, %v955_v16 }
 0x786   :  { %v957_v20 = vadd.f32 %v1142_v14, %v956_v18 }
 0x788   :  { %v961_v22 = vsel %vm960_vm3, %v1142_v14, %v957_v20 }
 0x789   :  { %v966_v23 = vsel %vm963_vm4, %v965_v21, %v961_v22 }
 0x78a   :  { %v967_v24 = vmul.f32 %v1140_v11, %v966_v23 }
 0x78c   :  { %968 = vst.msk [vmem:[%s1487_s10] sm:$0xff] %vm943_vm0, %v967_v24 }

</bundles_post_ra>
